<compile_context>
chip_gen: v7x
topology: tpu7x:2x2x1
jax: 0.10.0
libtpu: 0.0.40
codegen_flags: <defaults>
</compile_context>

<pallas_src>
import jax
import jax.numpy as jnp
import numpy as np
from jax import lax
from jax.experimental import pallas as pl
from jax.experimental.pallas import tpu as pltpu


# ----------------------------------------------------------------------------
# Pallas kernel
# ----------------------------------------------------------------------------
def _make_fp_kernel(num_layers: int, tm: int):
    """Kernel closed over the (static) number of MLP layers and the m tile size."""

    def kernel(*refs):
        # refs = unknown(3,TN), known(m,3), uf(C1,TN), kf(C2,m),
        #        w1a, w1b, b1, (w, b) * (num_layers-1), out(Cout,TN)
        unknown_ref, known_ref, uf_ref, kf_ref = refs[:4]
        w1a_ref, w1b_ref, b1_ref = refs[4], refs[5], refs[6]
        rest = refs[7:-1]
        out_ref = refs[-1]

        u = unknown_ref[0]                                   # (3, TN) f32
        ux, uy, uz = u[0:1, :], u[1:2, :], u[2:3, :]         # (1, TN)
        tn = u.shape[1]
        m_pad = known_ref.shape[1]
        num_mt = m_pad // tm

        inf = jnp.float32(jnp.inf)
        big_i = jnp.int32(2 ** 30)

        # running top-3 (distance^2, global index), row-oriented (1, TN)
        d0 = jnp.full((1, tn), inf, jnp.float32)
        d1 = jnp.full((1, tn), inf, jnp.float32)
        d2 = jnp.full((1, tn), inf, jnp.float32)
        i0 = jnp.zeros((1, tn), jnp.int32)
        i1 = jnp.zeros((1, tn), jnp.int32)
        i2 = jnp.zeros((1, tn), jnp.int32)

        row_local = lax.broadcasted_iota(jnp.int32, (tm, tn), 0)

        # ---- pass 1: streaming three_nn over m-tiles -------------------------
        for t in range(num_mt):
            k = known_ref[0, t * tm:(t + 1) * tm, :]          # (tm, 3) f32
            dx = k[:, 0:1] - ux
            dy = k[:, 1:2] - uy
            dz = k[:, 2:3] - uz
            work = dx * dx + dy * dy + dz * dz                # (tm, tn) f32
            rows = row_local + t * tm
            for _ in range(3):
                dmin = jnp.min(work, axis=0, keepdims=True)   # (1, tn)
                imin = jnp.min(jnp.where(work == dmin, rows, big_i),
                               axis=0, keepdims=True)         # first argmin
                # CUDA-style insertion with strict '<' (earlier index wins ties)
                lt0 = dmin < d0
                lt1 = dmin < d1
                lt2 = dmin < d2
                sh01 = jnp.logical_or(lt0, lt1)
                nd0 = jnp.where(lt0, dmin, d0)
                ni0 = jnp.where(lt0, imin, i0)
                nd1 = jnp.where(lt0, d0, jnp.where(lt1, dmin, d1))
                ni1 = jnp.where(lt0, i0, jnp.where(lt1, imin, i1))
                nd2 = jnp.where(sh01, d1, jnp.where(lt2, dmin, d2))
                ni2 = jnp.where(sh01, i1, jnp.where(lt2, imin, i2))
                d0, i0, d1, i1, d2, i2 = nd0, ni0, nd1, ni1, nd2, ni2
                work = jnp.where(rows == imin, inf, work)

        # ---- inverse-distance weights (f32) ----------------------------------
        r0 = 1.0 / (jnp.sqrt(d0) + 1e-8)
        r1 = 1.0 / (jnp.sqrt(d1) + 1e-8)
        r2 = 1.0 / (jnp.sqrt(d2) + 1e-8)
        inv_norm = pl.reciprocal(r0 + r1 + r2, approx=True)
        w0 = r0 * inv_norm
        w1 = r1 * inv_norm
        w2 = r2 * inv_norm                                    # (1, tn) f32

        # ---- pass 2: three_interpolate, accumulated per m-tile ---------------
        c2 = kf_ref.shape[1]
        interp = jnp.zeros((c2, tn), jnp.float32)
        for t in range(num_mt):
            rows = row_local + t * tm
            wt = (jnp.where(rows == i0, w0, 0.0)
                  + jnp.where(rows == i1, w1, 0.0)
                  + jnp.where(rows == i2, w2, 0.0))           # (tm, tn) f32
            kft = kf_ref[0, :, t * tm:(t + 1) * tm]           # (c2, tm) bf16
            interp = interp + jnp.dot(kft, wt.astype(jnp.bfloat16),
                                      preferred_element_type=jnp.float32)

        # ---- shared MLP (conv1x1 + folded BN + ReLU), channel-major ----------
        # first layer split into interp / uf halves -> no channel concat needed
        x = jnp.dot(w1a_ref[...], interp.astype(jnp.bfloat16),
                    preferred_element_type=jnp.float32)
        x = x + jnp.dot(w1b_ref[...], uf_ref[0],
                        preferred_element_type=jnp.float32)
        x = jnp.maximum(x + b1_ref[...], 0.0)
        for li in range(num_layers - 1):
            w_ref = rest[2 * li]
            b_ref = rest[2 * li + 1]
            x = jnp.dot(w_ref[...], x.astype(jnp.bfloat16),
                        preferred_element_type=jnp.float32)
            x = jnp.maximum(x + b_ref[...], 0.0)

        out_ref[0] = x.astype(out_ref.dtype)                  # (Cout, TN), lane-dense

    return kernel


# ----------------------------------------------------------------------------
# Wrapper: tiling, padding, BN folding, pallas_call setup
# ----------------------------------------------------------------------------
def pointnet_fp_forward(unknown, known, unknow_feats, known_feats, params,
                        bn_eps: float = 1e-5):
    """
    unknown:      (B, n, 3)
    known:        (B, m, 3)
    unknow_feats: (B, C1, n)
    known_feats:  (B, C2, m)
    params: per MLP layer: weight (Cout, Cin) conv1x1, gamma/beta/mean/var (Cout,) BN (eval)
    returns: (B, mlp[-1], n)
    """
    # TODO(synk): the `known is None` / `unknow_feats is None` branches of the PyTorch
    # forward are not implemented (main propagation path only).
    B, n, _ = unknown.shape
    m = known.shape[1]
    C1 = unknow_feats.shape[1]
    C2 = known_feats.shape[1]
    assert m >= 3, "three_nn requires at least 3 known points"
    assert params[0]["weight"].shape[1] == C1 + C2, "mlp[0] must equal C2 + C1"

    f32, bf16 = jnp.float32, jnp.bfloat16

    # ---- tile sizes (lane axis = points) -------------------------------------
    TN_TARGET, TM_TARGET = 256, 512
    if n <= TN_TARGET:
        TN, n_pad = n, n
    else:
        TN = TN_TARGET
        n_pad = ((n + TN - 1) // TN) * TN
    if m <= TM_TARGET:
        TM, m_pad = m, m
    else:
        TM = TM_TARGET
        m_pad = ((m + TM - 1) // TM) * TM

    # ---- layout prep (no feature transposes: stay channel-major) -------------
    unk = unknown.astype(f32)
    if n_pad > n:
        unk = jnp.pad(unk, ((0, 0), (0, n_pad - n), (0, 0)))
    unk_t = jnp.transpose(unk, (0, 2, 1))                     # (B, 3, n_pad)

    kno = known.astype(f32)
    if m_pad > m:                                             # pads pushed far away
        kno = jnp.pad(kno, ((0, 0), (0, m_pad - m), (0, 0)), constant_values=1e9)

    uf = unknow_feats.astype(bf16)
    if n_pad > n:
        uf = jnp.pad(uf, ((0, 0), (0, 0), (0, n_pad - n)))
    kf = known_feats.astype(bf16)
    if m_pad > m:
        kf = jnp.pad(kf, ((0, 0), (0, 0), (0, m_pad - m)))

    # ---- fold eval-mode BN into (Cout, Cin) weights + per-channel shift -------
    folded = []
    for p in params:
        scale = p["gamma"] / jnp.sqrt(p["var"] + bn_eps)                  # (Cout,)
        w = (p["weight"] * scale[:, None]).astype(f32)                    # (Cout, Cin)
        s = (p["beta"] - p["mean"] * scale).reshape(-1, 1).astype(f32)    # (Cout, 1)
        folded.append((w, s))

    w1, b1 = folded[0]
    w1a = w1[:, :C2].astype(bf16)          # applied to interpolated feats
    w1b = w1[:, C2:].astype(bf16)          # applied to unknow_feats
    later = [(w.astype(bf16), s) for w, s in folded[1:]]
    c_out = folded[-1][0].shape[0]
    num_layers = len(folded)

    in_specs = [
        pl.BlockSpec((1, 3, TN), lambda b, i: (b, 0, i)),        # unknown, coord-major
        pl.BlockSpec((1, m_pad, 3), lambda b, i: (b, 0, 0)),     # known, point-major
        pl.BlockSpec((1, C1, TN), lambda b, i: (b, 0, i)),       # uf, channel-major
        pl.BlockSpec((1, C2, m_pad), lambda b, i: (b, 0, 0)),    # kf, channel-major
        pl.BlockSpec(w1a.shape, lambda b, i: (0, 0)),
        pl.BlockSpec(w1b.shape, lambda b, i: (0, 0)),
        pl.BlockSpec(b1.shape, lambda b, i: (0, 0)),
    ]
    args = [unk_t, kno, uf, kf, w1a, w1b, b1]
    for w, s in later:
        in_specs.append(pl.BlockSpec(w.shape, lambda b, i: (0, 0)))
        in_specs.append(pl.BlockSpec(s.shape, lambda b, i: (0, 0)))
        args += [w, s]

    out = pl.pallas_call(
        _make_fp_kernel(num_layers, TM),
        out_shape=jax.ShapeDtypeStruct((B, c_out, n_pad), f32),
        grid=(B, n_pad // TN),
        in_specs=in_specs,
        out_specs=pl.BlockSpec((1, c_out, TN), lambda b, i: (b, 0, i)),
        compiler_params=pltpu.CompilerParams(
            dimension_semantics=("parallel", "parallel"),
            vmem_limit_bytes=32 * 1024 * 1024,
        ),
    )(*args)

    return out[:, :, :n]                                       # (B, Cout, n)


# ----------------------------------------------------------------------------
# Pure-JAX f32 reference (for correctness check)
# ----------------------------------------------------------------------------
def reference_forward(unknown, known, unknow_feats, known_feats, params,
                      bn_eps: float = 1e-5):
    u2 = jnp.sum(unknown ** 2, -1, keepdims=True)                        # (B, n, 1)
    k2 = jnp.sum(known ** 2, -1)                                         # (B, m)
    uk = jnp.einsum('bnc,bmc->bnm', unknown, known)
    d2 = jnp.maximum(u2 + k2[:, None, :] - 2.0 * uk, 0.0)                # (B, n, m)
    neg_vals, idx = lax.top_k(-d2, 3)                                    # 3 nearest
    dist = jnp.sqrt(-neg_vals)
    recip = 1.0 / (dist + 1e-8)
    weight = recip / jnp.sum(recip, -1, keepdims=True)                   # (B, n, 3)
    gathered = jnp.take_along_axis(known_feats[:, :, None, :],
                                   idx[:, None, :, :], axis=3)           # (B, C2, n, 3)
    interp = jnp.sum(gathered * weight[:, None, :, :], axis=3)           # (B, C2, n)
    x = jnp.concatenate([interp, unknow_feats], axis=1)
    for p in params:
        scale = p["gamma"] / jnp.sqrt(p["var"] + bn_eps)
        y = jnp.einsum('oc,bcn->bon', p["weight"], x)
        y = y * scale[None, :, None] + (p["beta"] - p["mean"] * scale)[None, :, None]
        x = jnp.maximum(y, 0.0)
    return x


# ----------------------------------------------------------------------------
# main
# ----------------------------------------------------------------------------
if __name__ == "__main__":
    key = jax.random.PRNGKey(0)
    B, n, m = 2, 16, 8
    C1, C2 = 8, 8                      # unknow_feats / known_feats channels
    mlp = [C2 + C1, 32, 16]            # Conv2d in/out channels per layer

    k_unknown, k_known, k_uf, k_kf, k_w = jax.random.split(key, 5)
    unknown = jax.random.normal(k_unknown, (B, n, 3), jnp.float32)
    known = jax.random.normal(k_known, (B, m, 3), jnp.float32)
    unknow_feats = jax.random.normal(k_uf, (B, C1, n), jnp.float32)
    known_feats = jax.random.normal(k_kf, (B, C2, m), jnp.float32)

    # Deterministic parameters with non-trivial eval-mode BN stats.
    params = []
    wkeys = jax.random.split(k_w, 4 * (len(mlp) - 1))
    for li in range(len(mlp) - 1):
        cin, cout = mlp[li], mlp[li + 1]
        kw, kg, kb, km = wkeys[4 * li:4 * li + 4]
        params.append(dict(
            weight=0.1 * jax.random.normal(kw, (cout, cin), jnp.float32),
            gamma=1.0 + 0.1 * jax.random.normal(kg, (cout,), jnp.float32),
            beta=0.1 * jax.random.normal(kb, (cout,), jnp.float32),
            mean=0.1 * jax.random.normal(km, (cout,), jnp.float32),
            var=jnp.full((cout,), 1.0, jnp.float32),
        ))

    out = pointnet_fp_forward(unknown, known, unknow_feats, known_feats, params)
    out = jax.block_until_ready(out)

    ref = reference_forward(unknown, known, unknow_feats, known_feats, params)
    ref = jax.block_until_ready(ref)

    assert out.shape == (B, mlp[-1], n), out.shape
    # Tolerance loosened vs. a pure-f32 kernel: the MLP / interpolation matmuls run
    # bf16-in / f32-accumulate and the weight normalisation uses the EUP approximate
    # reciprocal; the distance / neighbour-selection path stays f32.
    np.testing.assert_allclose(np.asarray(out), np.asarray(ref), rtol=3e-2, atol=3e-2)
    print("KERNEL_OK")
</pallas_src>

<mosaic_0001>
module attributes {stable_mosaic.version = 11 : i64} {
  func.func @kernel(%arg0: i32, %arg1: i32, %arg2: memref<1x3x16xf32, #tpu.memory_space<vmem>>, %arg3: memref<1x8x3xf32, #tpu.memory_space<vmem>>, %arg4: memref<1x8x16xbf16, #tpu.memory_space<vmem>>, %arg5: memref<1x8x8xbf16, #tpu.memory_space<vmem>>, %arg6: memref<32x8xbf16, #tpu.memory_space<vmem>>, %arg7: memref<32x8xbf16, #tpu.memory_space<vmem>>, %arg8: memref<32x1xf32, #tpu.memory_space<vmem>>, %arg9: memref<16x32xbf16, #tpu.memory_space<vmem>>, %arg10: memref<16x1xf32, #tpu.memory_space<vmem>>, %arg11: memref<1x16x16xf32, #tpu.memory_space<vmem>>) attributes {dimension_semantics = [#tpu.dimension_semantics<parallel>, #tpu.dimension_semantics<parallel>], iteration_bounds = array<i64: 2, 1>, scalar_prefetch = 0 : i64, scratch_operands = 0 : i64, tpu.core_type = #tpu.core_type<tc>, window_params = [{transform_indices = @transform_0, window_bounds = array<i64: 1, 3, 16>}, {transform_indices = @transform_1, window_bounds = array<i64: 1, 8, 3>}, {transform_indices = @transform_2, window_bounds = array<i64: 1, 8, 16>}, {transform_indices = @transform_3, window_bounds = array<i64: 1, 8, 8>}, {pipeline_mode = #tpu.pipeline_mode<synchronous>, transform_indices = @transform_4, window_bounds = array<i64: 32, 8>}, {pipeline_mode = #tpu.pipeline_mode<synchronous>, transform_indices = @transform_5, window_bounds = array<i64: 32, 8>}, {pipeline_mode = #tpu.pipeline_mode<synchronous>, transform_indices = @transform_6, window_bounds = array<i64: 32, 1>}, {pipeline_mode = #tpu.pipeline_mode<synchronous>, transform_indices = @transform_7, window_bounds = array<i64: 16, 32>}, {pipeline_mode = #tpu.pipeline_mode<synchronous>, transform_indices = @transform_8, window_bounds = array<i64: 16, 1>}, {transform_indices = @transform_9, window_bounds = array<i64: 1, 16, 16>}]} {
    %c0 = arith.constant 0 : index
    %c0_0 = arith.constant 0 : index
    %c0_1 = arith.constant 0 : index
    %0 = vector.load %arg2[%c0, %c0_0, %c0_1] : memref<1x3x16xf32, #tpu.memory_space<vmem>>, vector<1x3x16xf32>
    %1 = vector.shape_cast %0 : vector<1x3x16xf32> to vector<3x16xf32>
    %2 = vector.extract_strided_slice %1 {offsets = [0, 0], sizes = [1, 16], strides = [1, 1]} : vector<3x16xf32> to vector<1x16xf32>
    %3 = vector.extract_strided_slice %1 {offsets = [1, 0], sizes = [1, 16], strides = [1, 1]} : vector<3x16xf32> to vector<1x16xf32>
    %4 = vector.extract_strided_slice %1 {offsets = [2, 0], sizes = [1, 16], strides = [1, 1]} : vector<3x16xf32> to vector<1x16xf32>
    %cst = arith.constant 0x7F800000 : f32
    %5 = vector.broadcast %cst : f32 to vector<1x16xf32>
    %cst_2 = arith.constant 0x7F800000 : f32
    %6 = vector.broadcast %cst_2 : f32 to vector<1x16xf32>
    %cst_3 = arith.constant 0x7F800000 : f32
    %7 = vector.broadcast %cst_3 : f32 to vector<1x16xf32>
    %c0_i32 = arith.constant 0 : i32
    %8 = vector.broadcast %c0_i32 : i32 to vector<1x16xi32>
    %c0_i32_4 = arith.constant 0 : i32
    %9 = vector.broadcast %c0_i32_4 : i32 to vector<1x16xi32>
    %c0_i32_5 = arith.constant 0 : i32
    %10 = vector.broadcast %c0_i32_5 : i32 to vector<1x16xi32>
    %11 = tpu.iota {dimensions = array<i32: 0>} : vector<8x16xi32>
    %c0_6 = arith.constant 0 : index
    %c0_7 = arith.constant 0 : index
    %c0_8 = arith.constant 0 : index
    %12 = vector.load %arg3[%c0_6, %c0_7, %c0_8] : memref<1x8x3xf32, #tpu.memory_space<vmem>>, vector<1x8x3xf32>
    %13 = vector.shape_cast %12 : vector<1x8x3xf32> to vector<8x3xf32>
    %14 = vector.extract_strided_slice %13 {offsets = [0, 0], sizes = [8, 1], strides = [1, 1]} : vector<8x3xf32> to vector<8x1xf32>
    %15 = vector.broadcast %14 : vector<8x1xf32> to vector<8x16xf32>
    %16 = vector.broadcast %2 : vector<1x16xf32> to vector<8x16xf32>
    %17 = arith.subf %15, %16 : vector<8x16xf32>
    %18 = vector.extract_strided_slice %13 {offsets = [0, 1], sizes = [8, 1], strides = [1, 1]} : vector<8x3xf32> to vector<8x1xf32>
    %19 = vector.broadcast %18 : vector<8x1xf32> to vector<8x16xf32>
    %20 = vector.broadcast %3 : vector<1x16xf32> to vector<8x16xf32>
    %21 = arith.subf %19, %20 : vector<8x16xf32>
    %22 = vector.extract_strided_slice %13 {offsets = [0, 2], sizes = [8, 1], strides = [1, 1]} : vector<8x3xf32> to vector<8x1xf32>
    %23 = vector.broadcast %22 : vector<8x1xf32> to vector<8x16xf32>
    %24 = vector.broadcast %4 : vector<1x16xf32> to vector<8x16xf32>
    %25 = arith.subf %23, %24 : vector<8x16xf32>
    %26 = arith.mulf %17, %17 : vector<8x16xf32>
    %27 = arith.mulf %21, %21 : vector<8x16xf32>
    %28 = arith.addf %26, %27 : vector<8x16xf32>
    %29 = arith.mulf %25, %25 : vector<8x16xf32>
    %30 = arith.addf %28, %29 : vector<8x16xf32>
    %c0_i32_9 = arith.constant 0 : i32
    %31 = vector.broadcast %c0_i32_9 : i32 to vector<8x16xi32>
    %32 = arith.addi %11, %31 : vector<8x16xi32>
    %cst_10 = arith.constant dense<0x7F800000> : vector<16xf32>
    %33 = vector.multi_reduction <minimumf>, %30, %cst_10 [0] : vector<8x16xf32> to vector<16xf32>
    %34 = vector.shape_cast %33 : vector<16xf32> to vector<1x16xf32>
    %35 = vector.broadcast %34 : vector<1x16xf32> to vector<8x16xf32>
    %36 = arith.cmpf oeq, %30, %35 : vector<8x16xf32>
    %c1073741824_i32 = arith.constant 1073741824 : i32
    %37 = vector.broadcast %c1073741824_i32 : i32 to vector<8x16xi32>
    %38 = arith.select %36, %32, %37 : vector<8x16xi1>, vector<8x16xi32>
    %cst_11 = arith.constant dense<2147483647> : vector<16xi32>
    %39 = vector.multi_reduction <minsi>, %38, %cst_11 [0] : vector<8x16xi32> to vector<16xi32>
    %40 = vector.shape_cast %39 : vector<16xi32> to vector<1x16xi32>
    %41 = arith.cmpf olt, %34, %5 : vector<1x16xf32>
    %42 = arith.cmpf olt, %34, %6 : vector<1x16xf32>
    %43 = arith.cmpf olt, %34, %7 : vector<1x16xf32>
    %44 = arith.ori %41, %42 : vector<1x16xi1>
    %45 = arith.select %41, %34, %5 : vector<1x16xi1>, vector<1x16xf32>
    %46 = arith.select %41, %40, %8 : vector<1x16xi1>, vector<1x16xi32>
    %47 = arith.select %42, %34, %6 : vector<1x16xi1>, vector<1x16xf32>
    %48 = arith.select %41, %5, %47 : vector<1x16xi1>, vector<1x16xf32>
    %49 = arith.select %42, %40, %9 : vector<1x16xi1>, vector<1x16xi32>
    %50 = arith.select %41, %8, %49 : vector<1x16xi1>, vector<1x16xi32>
    %51 = arith.select %43, %34, %7 : vector<1x16xi1>, vector<1x16xf32>
    %52 = arith.select %44, %6, %51 : vector<1x16xi1>, vector<1x16xf32>
    %53 = arith.select %43, %40, %10 : vector<1x16xi1>, vector<1x16xi32>
    %54 = arith.select %44, %9, %53 : vector<1x16xi1>, vector<1x16xi32>
    %55 = vector.broadcast %40 : vector<1x16xi32> to vector<8x16xi32>
    %56 = arith.cmpi eq, %32, %55 : vector<8x16xi32>
    %cst_12 = arith.constant 0x7F800000 : f32
    %57 = vector.broadcast %cst_12 : f32 to vector<8x16xf32>
    %58 = arith.select %56, %57, %30 : vector<8x16xi1>, vector<8x16xf32>
    %cst_13 = arith.constant dense<0x7F800000> : vector<16xf32>
    %59 = vector.multi_reduction <minimumf>, %58, %cst_13 [0] : vector<8x16xf32> to vector<16xf32>
    %60 = vector.shape_cast %59 : vector<16xf32> to vector<1x16xf32>
    %61 = vector.broadcast %60 : vector<1x16xf32> to vector<8x16xf32>
    %62 = arith.cmpf oeq, %58, %61 : vector<8x16xf32>
    %c1073741824_i32_14 = arith.constant 1073741824 : i32
    %63 = vector.broadcast %c1073741824_i32_14 : i32 to vector<8x16xi32>
    %64 = arith.select %62, %32, %63 : vector<8x16xi1>, vector<8x16xi32>
    %cst_15 = arith.constant dense<2147483647> : vector<16xi32>
    %65 = vector.multi_reduction <minsi>, %64, %cst_15 [0] : vector<8x16xi32> to vector<16xi32>
    %66 = vector.shape_cast %65 : vector<16xi32> to vector<1x16xi32>
    %67 = arith.cmpf olt, %60, %45 : vector<1x16xf32>
    %68 = arith.cmpf olt, %60, %48 : vector<1x16xf32>
    %69 = arith.cmpf olt, %60, %52 : vector<1x16xf32>
    %70 = arith.ori %67, %68 : vector<1x16xi1>
    %71 = arith.select %67, %60, %45 : vector<1x16xi1>, vector<1x16xf32>
    %72 = arith.select %67, %66, %46 : vector<1x16xi1>, vector<1x16xi32>
    %73 = arith.select %68, %60, %48 : vector<1x16xi1>, vector<1x16xf32>
    %74 = arith.select %67, %45, %73 : vector<1x16xi1>, vector<1x16xf32>
    %75 = arith.select %68, %66, %50 : vector<1x16xi1>, vector<1x16xi32>
    %76 = arith.select %67, %46, %75 : vector<1x16xi1>, vector<1x16xi32>
    %77 = arith.select %69, %60, %52 : vector<1x16xi1>, vector<1x16xf32>
    %78 = arith.select %70, %48, %77 : vector<1x16xi1>, vector<1x16xf32>
    %79 = arith.select %69, %66, %54 : vector<1x16xi1>, vector<1x16xi32>
    %80 = arith.select %70, %50, %79 : vector<1x16xi1>, vector<1x16xi32>
    %81 = vector.broadcast %66 : vector<1x16xi32> to vector<8x16xi32>
    %82 = arith.cmpi eq, %32, %81 : vector<8x16xi32>
    %cst_16 = arith.constant 0x7F800000 : f32
    %83 = vector.broadcast %cst_16 : f32 to vector<8x16xf32>
    %84 = arith.select %82, %83, %58 : vector<8x16xi1>, vector<8x16xf32>
    %cst_17 = arith.constant dense<0x7F800000> : vector<16xf32>
    %85 = vector.multi_reduction <minimumf>, %84, %cst_17 [0] : vector<8x16xf32> to vector<16xf32>
    %86 = vector.shape_cast %85 : vector<16xf32> to vector<1x16xf32>
    %87 = vector.broadcast %86 : vector<1x16xf32> to vector<8x16xf32>
    %88 = arith.cmpf oeq, %84, %87 : vector<8x16xf32>
    %c1073741824_i32_18 = arith.constant 1073741824 : i32
    %89 = vector.broadcast %c1073741824_i32_18 : i32 to vector<8x16xi32>
    %90 = arith.select %88, %32, %89 : vector<8x16xi1>, vector<8x16xi32>
    %cst_19 = arith.constant dense<2147483647> : vector<16xi32>
    %91 = vector.multi_reduction <minsi>, %90, %cst_19 [0] : vector<8x16xi32> to vector<16xi32>
    %92 = vector.shape_cast %91 : vector<16xi32> to vector<1x16xi32>
    %93 = arith.cmpf olt, %86, %71 : vector<1x16xf32>
    %94 = arith.cmpf olt, %86, %74 : vector<1x16xf32>
    %95 = arith.cmpf olt, %86, %78 : vector<1x16xf32>
    %96 = arith.ori %93, %94 : vector<1x16xi1>
    %97 = arith.select %93, %86, %71 : vector<1x16xi1>, vector<1x16xf32>
    %98 = arith.select %93, %92, %72 : vector<1x16xi1>, vector<1x16xi32>
    %99 = arith.select %94, %86, %74 : vector<1x16xi1>, vector<1x16xf32>
    %100 = arith.select %93, %71, %99 : vector<1x16xi1>, vector<1x16xf32>
    %101 = arith.select %94, %92, %76 : vector<1x16xi1>, vector<1x16xi32>
    %102 = arith.select %93, %72, %101 : vector<1x16xi1>, vector<1x16xi32>
    %103 = arith.select %95, %86, %78 : vector<1x16xi1>, vector<1x16xf32>
    %104 = arith.select %96, %74, %103 : vector<1x16xi1>, vector<1x16xf32>
    %105 = arith.select %95, %92, %80 : vector<1x16xi1>, vector<1x16xi32>
    %106 = arith.select %96, %76, %105 : vector<1x16xi1>, vector<1x16xi32>
    %107 = math.sqrt %97 : vector<1x16xf32>
    %cst_20 = arith.constant 9.99999993E-9 : f32
    %108 = vector.broadcast %cst_20 : f32 to vector<1x16xf32>
    %109 = arith.addf %107, %108 : vector<1x16xf32>
    %cst_21 = arith.constant 1.000000e+00 : f32
    %110 = vector.broadcast %cst_21 : f32 to vector<1x16xf32>
    %111 = arith.divf %110, %109 : vector<1x16xf32>
    %112 = math.sqrt %100 : vector<1x16xf32>
    %cst_22 = arith.constant 9.99999993E-9 : f32
    %113 = vector.broadcast %cst_22 : f32 to vector<1x16xf32>
    %114 = arith.addf %112, %113 : vector<1x16xf32>
    %cst_23 = arith.constant 1.000000e+00 : f32
    %115 = vector.broadcast %cst_23 : f32 to vector<1x16xf32>
    %116 = arith.divf %115, %114 : vector<1x16xf32>
    %117 = math.sqrt %104 : vector<1x16xf32>
    %cst_24 = arith.constant 9.99999993E-9 : f32
    %118 = vector.broadcast %cst_24 : f32 to vector<1x16xf32>
    %119 = arith.addf %117, %118 : vector<1x16xf32>
    %cst_25 = arith.constant 1.000000e+00 : f32
    %120 = vector.broadcast %cst_25 : f32 to vector<1x16xf32>
    %121 = arith.divf %120, %119 : vector<1x16xf32>
    %122 = arith.addf %111, %116 : vector<1x16xf32>
    %123 = arith.addf %122, %121 : vector<1x16xf32>
    %124 = tpu.reciprocal %123 {approx = true} : vector<1x16xf32> -> vector<1x16xf32>
    %125 = arith.mulf %111, %124 : vector<1x16xf32>
    %126 = arith.mulf %116, %124 : vector<1x16xf32>
    %127 = arith.mulf %121, %124 : vector<1x16xf32>
    %cst_26 = arith.constant 0.000000e+00 : f32
    %128 = vector.broadcast %cst_26 : f32 to vector<8x16xf32>
    %c0_i32_27 = arith.constant 0 : i32
    %129 = vector.broadcast %c0_i32_27 : i32 to vector<8x16xi32>
    %130 = arith.addi %11, %129 : vector<8x16xi32>
    %131 = vector.broadcast %98 : vector<1x16xi32> to vector<8x16xi32>
    %132 = arith.cmpi eq, %130, %131 : vector<8x16xi32>
    %cst_28 = arith.constant 0.000000e+00 : f32
    %133 = vector.shape_cast %125 : vector<1x16xf32> to vector<1x16xf32>
    %134 = vector.broadcast %133 : vector<1x16xf32> to vector<8x16xf32>
    %135 = vector.broadcast %cst_28 : f32 to vector<8x16xf32>
    %136 = arith.select %132, %134, %135 : vector<8x16xi1>, vector<8x16xf32>
    %137 = vector.broadcast %102 : vector<1x16xi32> to vector<8x16xi32>
    %138 = arith.cmpi eq, %130, %137 : vector<8x16xi32>
    %cst_29 = arith.constant 0.000000e+00 : f32
    %139 = vector.shape_cast %126 : vector<1x16xf32> to vector<1x16xf32>
    %140 = vector.broadcast %139 : vector<1x16xf32> to vector<8x16xf32>
    %141 = vector.broadcast %cst_29 : f32 to vector<8x16xf32>
    %142 = arith.select %138, %140, %141 : vector<8x16xi1>, vector<8x16xf32>
    %143 = arith.addf %136, %142 : vector<8x16xf32>
    %144 = vector.broadcast %106 : vector<1x16xi32> to vector<8x16xi32>
    %145 = arith.cmpi eq, %130, %144 : vector<8x16xi32>
    %cst_30 = arith.constant 0.000000e+00 : f32
    %146 = vector.shape_cast %127 : vector<1x16xf32> to vector<1x16xf32>
    %147 = vector.broadcast %146 : vector<1x16xf32> to vector<8x16xf32>
    %148 = vector.broadcast %cst_30 : f32 to vector<8x16xf32>
    %149 = arith.select %145, %147, %148 : vector<8x16xi1>, vector<8x16xf32>
    %150 = arith.addf %143, %149 : vector<8x16xf32>
    %c0_31 = arith.constant 0 : index
    %c0_32 = arith.constant 0 : index
    %c0_33 = arith.constant 0 : index
    %151 = vector.load %arg5[%c0_31, %c0_32, %c0_33] : memref<1x8x8xbf16, #tpu.memory_space<vmem>>, vector<1x8x8xbf16>
    %152 = vector.shape_cast %151 : vector<1x8x8xbf16> to vector<8x8xbf16>
    %153 = arith.truncf %150 : vector<8x16xf32> to vector<8x16xbf16>
    %cst_34 = arith.constant dense<0.000000e+00> : vector<8x16xf32>
    %154 = tpu.matmul %152, %153, %cst_34 {dimension_numbers = #tpu.dot_dimension_numbers<[1], [0], [0], [1], [0, 0, 1, 1], [], []>} : vector<8x8xbf16>, vector<8x16xbf16>, vector<8x16xf32> -> vector<8x16xf32>
    %155 = arith.addf %128, %154 : vector<8x16xf32>
    %c0_35 = arith.constant 0 : index
    %c0_36 = arith.constant 0 : index
    %156 = vector.load %arg6[%c0_35, %c0_36] : memref<32x8xbf16, #tpu.memory_space<vmem>>, vector<32x8xbf16>
    %157 = arith.truncf %155 : vector<8x16xf32> to vector<8x16xbf16>
    %cst_37 = arith.constant dense<0.000000e+00> : vector<32x16xf32>
    %158 = tpu.matmul %156, %157, %cst_37 {dimension_numbers = #tpu.dot_dimension_numbers<[1], [0], [0], [1], [0, 0, 1, 1], [], []>} : vector<32x8xbf16>, vector<8x16xbf16>, vector<32x16xf32> -> vector<32x16xf32>
    %c0_38 = arith.constant 0 : index
    %c0_39 = arith.constant 0 : index
    %159 = vector.load %arg7[%c0_38, %c0_39] : memref<32x8xbf16, #tpu.memory_space<vmem>>, vector<32x8xbf16>
    %c0_40 = arith.constant 0 : index
    %c0_41 = arith.constant 0 : index
    %c0_42 = arith.constant 0 : index
    %160 = vector.load %arg4[%c0_40, %c0_41, %c0_42] : memref<1x8x16xbf16, #tpu.memory_space<vmem>>, vector<1x8x16xbf16>
    %161 = vector.shape_cast %160 : vector<1x8x16xbf16> to vector<8x16xbf16>
    %cst_43 = arith.constant dense<0.000000e+00> : vector<32x16xf32>
    %162 = tpu.matmul %159, %161, %cst_43 {dimension_numbers = #tpu.dot_dimension_numbers<[1], [0], [0], [1], [0, 0, 1, 1], [], []>} : vector<32x8xbf16>, vector<8x16xbf16>, vector<32x16xf32> -> vector<32x16xf32>
    %163 = arith.addf %158, %162 : vector<32x16xf32>
    %c0_44 = arith.constant 0 : index
    %c0_45 = arith.constant 0 : index
    %164 = vector.load %arg8[%c0_44, %c0_45] : memref<32x1xf32, #tpu.memory_space<vmem>>, vector<32x1xf32>
    %165 = vector.broadcast %164 : vector<32x1xf32> to vector<32x16xf32>
    %166 = arith.addf %163, %165 : vector<32x16xf32>
    %cst_46 = arith.constant 0.000000e+00 : f32
    %167 = vector.broadcast %cst_46 : f32 to vector<32x16xf32>
    %168 = arith.maximumf %166, %167 : vector<32x16xf32>
    %c0_47 = arith.constant 0 : index
    %c0_48 = arith.constant 0 : index
    %169 = vector.load %arg9[%c0_47, %c0_48] : memref<16x32xbf16, #tpu.memory_space<vmem>>, vector<16x32xbf16>
    %170 = arith.truncf %168 : vector<32x16xf32> to vector<32x16xbf16>
    %cst_49 = arith.constant dense<0.000000e+00> : vector<16x16xf32>
    %171 = tpu.matmul %169, %170, %cst_49 {dimension_numbers = #tpu.dot_dimension_numbers<[1], [0], [0], [1], [0, 0, 1, 1], [], []>} : vector<16x32xbf16>, vector<32x16xbf16>, vector<16x16xf32> -> vector<16x16xf32>
    %c0_50 = arith.constant 0 : index
    %c0_51 = arith.constant 0 : index
    %172 = vector.load %arg10[%c0_50, %c0_51] : memref<16x1xf32, #tpu.memory_space<vmem>>, vector<16x1xf32>
    %173 = vector.broadcast %172 : vector<16x1xf32> to vector<16x16xf32>
    %174 = arith.addf %171, %173 : vector<16x16xf32>
    %cst_52 = arith.constant 0.000000e+00 : f32
    %175 = vector.broadcast %cst_52 : f32 to vector<16x16xf32>
    %176 = arith.maximumf %174, %175 : vector<16x16xf32>
    %c0_53 = arith.constant 0 : index
    %c0_54 = arith.constant 0 : index
    %c0_55 = arith.constant 0 : index
    %177 = vector.load %arg11[%c0_53, %c0_54, %c0_55] : memref<1x16x16xf32, #tpu.memory_space<vmem>>, vector<1x16x16xf32>
    %178 = vector.shape_cast %177 : vector<1x16x16xf32> to vector<16x16xf32>
    %179 = vector.shape_cast %176 : vector<16x16xf32> to vector<1x16x16xf32>
    tpu.vector_store %arg11[%c0_53, %c0_54, %c0_55], %179 {strides = array<i32>} : memref<1x16x16xf32, #tpu.memory_space<vmem>>, vector<1x16x16xf32>,
    return
  }
  func.func @transform_0(%arg0: i32, %arg1: i32) -> (i32, i32, i32) {
    %c0_i32 = arith.constant 0 : i32
    %c0_i32_0 = arith.constant 0 : i32
    return %arg0, %c0_i32, %arg1 : i32, i32, i32
  }
  func.func @transform_1(%arg0: i32, %arg1: i32) -> (i32, i32, i32) {
    %c0_i32 = arith.constant 0 : i32
    %c0_i32_0 = arith.constant 0 : i32
    %c0_i32_1 = arith.constant 0 : i32
    return %arg0, %c0_i32, %c0_i32_0 : i32, i32, i32
  }
  func.func @transform_2(%arg0: i32, %arg1: i32) -> (i32, i32, i32) {
    %c0_i32 = arith.constant 0 : i32
    %c0_i32_0 = arith.constant 0 : i32
    return %arg0, %c0_i32, %arg1 : i32, i32, i32
  }
  func.func @transform_3(%arg0: i32, %arg1: i32) -> (i32, i32, i32) {
    %c0_i32 = arith.constant 0 : i32
    %c0_i32_0 = arith.constant 0 : i32
    %c0_i32_1 = arith.constant 0 : i32
    return %arg0, %c0_i32, %c0_i32_0 : i32, i32, i32
  }
  func.func @transform_4(%arg0: i32, %arg1: i32) -> (i32, i32) {
    %c0_i32 = arith.constant 0 : i32
    %c0_i32_0 = arith.constant 0 : i32
    %c0_i32_1 = arith.constant 0 : i32
    return %c0_i32, %c0_i32_0 : i32, i32
  }
  func.func @transform_5(%arg0: i32, %arg1: i32) -> (i32, i32) {
    %c0_i32 = arith.constant 0 : i32
    %c0_i32_0 = arith.constant 0 : i32
    %c0_i32_1 = arith.constant 0 : i32
    return %c0_i32, %c0_i32_0 : i32, i32
  }
  func.func @transform_6(%arg0: i32, %arg1: i32) -> (i32, i32) {
    %c0_i32 = arith.constant 0 : i32
    %c0_i32_0 = arith.constant 0 : i32
    %c0_i32_1 = arith.constant 0 : i32
    return %c0_i32, %c0_i32_0 : i32, i32
  }
  func.func @transform_7(%arg0: i32, %arg1: i32) -> (i32, i32) {
    %c0_i32 = arith.constant 0 : i32
    %c0_i32_0 = arith.constant 0 : i32
    %c0_i32_1 = arith.constant 0 : i32
    return %c0_i32, %c0_i32_0 : i32, i32
  }
  func.func @transform_8(%arg0: i32, %arg1: i32) -> (i32, i32) {
    %c0_i32 = arith.constant 0 : i32
    %c0_i32_0 = arith.constant 0 : i32
    %c0_i32_1 = arith.constant 0 : i32
    return %c0_i32, %c0_i32_0 : i32, i32
  }
  func.func @transform_9(%arg0: i32, %arg1: i32) -> (i32, i32, i32) {
    %c0_i32 = arith.constant 0 : i32
    %c0_i32_0 = arith.constant 0 : i32
    return %arg0, %c0_i32, %arg1 : i32, i32, i32
  }
}

</mosaic_0001>

<bundles_post_ra>
// kernel: tpu_custom_call.1
= control target key start
LH: loop header
LB: loop body
LE: loop exit
PB: predicated region body
PF: predicated region fallthrough
CT: control target
= control target key end

     0   :  { %14 = vsyncpa [#allocation3], 0  ;;  %s1616_s0 = inlined_call_operand.vmem [shape: f32[2,3,16], index: 0, kind: input, shape index: {}]   ;;  %s1617_s1 = inlined_call_operand.vmem [shape: f32[2,8,3], index: 1, kind: input, shape index: {}]   ;;  %s1618_s2 = inlined_call_operand.vmem [shape: bf16[2,8,16], index: 2, kind: input, shape index: {}]   ;;  %s1619_s3 = inlined_call_operand.vmem [shape: bf16[2,8,8], index: 3, kind: input, shape index: {}]   ;;  %s1620_s4 = inlined_call_operand.vmem [shape: bf16[32,8], index: 4, kind: input, shape index: {}]   ;;  %s1621_s5 = inlined_call_operand.vmem [shape: bf16[32,8], index: 5, kind: input, shape index: {}]   ;;  %s1622_s6 = inlined_call_operand.vmem [shape: f32[32,1], index: 6, kind: input, shape index: {}]   ;;  %s1623_s7 = inlined_call_operand.vmem [shape: bf16[16,32], index: 7, kind: input, shape index: {}]   ;;  %s1624_s8 = inlined_call_operand.vmem [shape: f32[16,1], index: 8, kind: input, shape index: {}]   ;;  %s1625_s9 = inlined_call_operand.hbm [shape: f32[2,16,16], index: 9, kind: output, shape index: {}]  }
   0x1   :  { %16 = vsyncpa [#allocation3 + $0x1], 0  ;;  %s1308_s30 = smov 0   ;;  %s1310_s10 = smov 0  }
   0x2   :  { %s1312_s11 = smov 0   ;;  %s1314_s12 = smov 0  }
   0x3   :  { %s1316_s13 = smov 0   ;;  %s1318_s14 = smov 0  }
   0x4 LB: > { %s1014_s15 = sadd.s32 4294967295, %s1248_s14   ;;  %s1015_s16 = sadd.s32 4294967294, %s1248_s14   ;;  %s1248_s14 = sphi %s1318_s14, %s22_s14   ;;  %s1244_s13 = sphi %s1316_s13, %s1649_s13   ;;  %s1240_s12 = sphi %s1314_s12, %s1648_s12   ;;  %s1236_s11 = sphi %s1312_s11, %s1647_s11   ;;  %s1232_s10 = sphi %s1310_s10, %s1646_s10   ;;  %s1228_s30 = sphi %s1308_s30, %s1645_s30  }
   0x5   : > { %s34_s17 = sadd.s32 1, %s1244_s13  ;;  %s256_s18 = sadd.s32 1, %s1236_s11 }
   0x6   : > { %p36_p0 = scmp.ge.s32.totalorder %s34_s17, 2  ;;  %p266_p1 = scmp.ne.s32.totalorder %s1236_s11, %s1232_s10 }
   0x7   : > { %p267_p2 = scmp.eq.s32.totalorder %s1014_s15, 1  ;;  %p272_p3 = scmp.ne.s32.totalorder %s1232_s10, %s1228_s30 }
   0x8   : > { %s1651_s17 = smov (%p36_p0, %s34_s17), 0  ;;  %p273_p5 = scmp.eq.s32.totalorder %s1015_s16, 1 }
   0x9   : > { %p1348_p4 = por %p267_p2, %p266_p1  ;;  %s251_s20 = ssub.s32 %s1244_s13, %s1651_s17 }
   0xa   : > { %p1018_p6 = scmp.ge.s32.totalorder %s1248_s14, 1  ;;  %p254_p7 = scmp.eq.s32.totalorder %s251_s20, 0 }
   0xb   : > { %p1355_p8 = por %p273_p5, %p272_p3  ;;  %p340_p9 = scmp.lt.s32.totalorder %s1248_s14, 3 }
   0xc   : > { %s1361_s22 = scalar_select %p254_p7, %s1236_s11, %s256_s18  }
   0xd   : > { %p341_p10 = pnand %p1018_p6, %p340_p9 }
   0xe   : > { %p393_p11 = scmp.lt.s32.totalorder (!%p341_p10), %s1240_s12, 1  ;;  %v1250_v0 = vmov (!%p341_p10), 0   ;;  %v1251_v1 = vmov (!%p341_p10), 2   ;;  %v1252_v3 = vmov (!%p341_p10), 1   ;;  %v1253_v4 = vmov (!%p341_p10), 0.0   ;;  %v1151_v29 = vld [vmem:[%s1621_s5] sm:$0xff] (!%p341_p10)  }
   0xf   : > { %344 = sbr.rel (%p341_p10) target bundleno = 979 (0x3d3), region = 56  ;;  %1146 = vset.pattern.permute.xlu0 (!%p341_p10), %v1250_v0  ;;  %1148 = vset.pattern.permute.xlu1 (!%p341_p10), %v1251_v1  ;;  %v417_v5 = vlaneseq (!%p341_p10)  ;;  %vm1628_vm0 = vcmask (!%p341_p10), 130048   ;;  %vm1626_vm1 = vmmov (!%p341_p10), 0   ;;  %vm593_vm2 = vcmask (!%p341_p10), 1043456   ;;  %v1152_v33 = vld [vmem:[%s1621_s5 + $0x8] sm:$0xff] (!%p341_p10)   ;;  %s1040_s18 = sshll.u32 (!%p341_p10), %s1240_s12, 8 }
  0x10   : > { %1052 = vmatprep.subr.bf16.mxu0 (!%p341_p10), %v1253_v4  ;;  %1054 = vmatprep.mubr.msk.bf16.mxu0 (!%p341_p10), %vm1626_vm1, %v1253_v4  ;;  %vm1627_vm3 = vcmask (!%p341_p10), 64512   ;;  %s1255_s25 = smov (!%p341_p10), [#allocation2]  }
  0x11   : > { %v1371_v6 = vshrl.u32 (!%p341_p10), %v417_v5, 7  ;;  %1060 = vmatprep.mubr.msk.bf16.mxu1 (!%p341_p10), %vm1627_vm3, %v1151_v29  ;;  %s1174_s26 = sshll.u32 (!%p341_p10), %s1255_s25, 4  ;;  %s1175_s26 = int_to_ptr.vmem [resolvable:$false] %s1174_s26 }
  0x13   : > { %v427_v7 = vsub.s32 (!%p341_p10), 0, %v1371_v6  ;;  %v445_v8 = vsub.s32 (!%p341_p10), 2, %v1371_v6  ;;  %v436_v10 = vsub.s32 (!%p341_p10), 1, %v1371_v6 }
  0x16   : > { %s394_s23 = scalar_select %p393_p11, %s1240_s12, 1 }
  0x18   : > { %s1021_s24 = sshll.u32 %s394_s23, 3  ;;  %s1369_s28 = sshll.u32 %s394_s23, 2 }
  0x19   : > { %s403_s27 = scalar_lea.vmem %s1617_s1, %s1021_s24  ;;  %s399_s16 = scalar_lea.vmem %s1616_s0, %s1369_s28 }
  0x1a   : > { %v419_v2 = vld [vmem:[%s403_s27] sm:$0xff]  ;;  %s410_s23 = scalar_lea.vmem %s1618_s2, %s1369_s28  ;;  %s390_s27 = sand.u32 1, %s1232_s10  }
  0x1b   : > { %422 = vperm.xlu0 %1146, %v419_v2   ;;  %440 = vperm.xlu1 %1148, %v419_v2   ;;  %v416_v9 = vld [vmem:[%s399_s16] sm:$0x7]  ;;  %s414_s16 = scalar_lea.vmem %s1619_s3, %s1369_s28  ;;  %s1019_s29 = sshll.u32 %s390_s27, 4 }
  0x1c   : > { %v428_v12 = vrot.slane %v416_v9, %v427_v7  ;;  %v446_v13 = vrot.slane %v416_v9, %v445_v8  ;;  %v437_v15 = vrot.slane %v416_v9, %v436_v10  ;;  %v646_v31 = vld [vmem:[%s410_s23] sm:$0xf]  ;;  %s392_s15 = scalar_lea.vmem [#allocation2], %s1019_s29  ;;  %s1567_s24 = scalar_lea.hbm %s1625_s9, %s1040_s18 }
  0x1d   : > { %1082 = vmatprep.subr.msk.bf16.mxu1 %vm593_vm2, %v646_v31  ;;  %v664_v32 = vsel %vm593_vm2, %v646_v31, 0  ;;  %s1570_s28 = scalar_lea.sflag [#allocation3], %s390_s27  ;;  %s1176_s29 = scalar_lea.vmem %s1175_s26, 512 }
  0x1e   : > { %1059 = vmatpush3.bf16.msra.mxu1 %v664_v32 }
  0x1f   : > { %1147 = vset.pattern.permute.xlu0 %v1252_v3  ;;  %1149 = vset.pattern.permute.xlu1 %v1250_v0 }
  0x20   : > { %431 = vperm.xlu0 %1147, %v419_v2  }
  0x21   : > { %1061 = vmatmul.mubr.msk.bf16.vlgmr.msra.gmra.mrb[0].mxu1 %vm1627_vm3, %v1152_v33 }
  0x24   : > { %1150 = vset.pattern.permute.xlu0 %v1250_v0 }
  0x9a   : > { %v423_v11 = vpop.permute.xlu0 %422  ;;  %v441_v14 = vpop.permute.xlu1 %440 }
  0x9b   : > { %v429_v16 = vsub.f32 %v423_v11, %v428_v12  ;;  %v447_v17 = vsub.f32 %v441_v14, %v446_v13  ;;  %v784_v13 = vld [vmem:[%s1622_s6 + $0x8] sm:$0xff] }
  0x9c   : > { %v820_v14 = vld [vmem:[%s1624_s8 + $0x8] sm:$0xff] }
  0x9d   : > { %v448_v20 = vmul.f32 %v429_v16, %v429_v16  ;;  %v451_v22 = vmul.f32 %v447_v17, %v447_v17 }
  0x9f   : > { %v432_v18 = vpop.permute.xlu0 %431 }
  0xa0   : > { %v438_v19 = vsub.f32 %v432_v18, %v437_v15 }
  0xa2   : > { %v449_v21 = vmul.f32 %v438_v19, %v438_v19 }
  0xa4   : > { %v450_v23 = vadd.f32 %v449_v21, %v448_v20 }
  0xa6   : > { %v452_v24 = vadd.f32 %v451_v22, %v450_v23 }
  0xa8   : > { %v454_v25 = vsel %vm1628_vm0, %v452_v24, inf }
  0xa9   : > { %v455_v26 = vrot.slane %v454_v25, 4 }
  0xab   : > { %v456_v27 = vmin.f32 %v454_v25, %v455_v26 }
  0xad   : > { %v457_v28 = vrot.slane %v456_v27, 2 }
  0xaf   : > { %v458_v30 = vmin.f32 %v456_v27, %v457_v28 }
  0xb1   : > { %v459_v34 = vrot.slane %v458_v30, 1 }
  0xb3   : > { %v1396_v35 = vmin.f32 %v458_v30, %v459_v34 }
  0xb5   : > { %vm461_vm4 = vcmp.eq.f32.partialorder %v452_v24, %v1396_v35  ;;  %vm473_vm14 = vcmp.lt.f32.partialorder %v1396_v35, inf }
  0xb6   : > { %v462_v36 = vsel %vm461_vm4, %v1371_v6, 1073741824  ;;  %v474_v1 = vsel %vm473_vm14, %v1396_v35, inf }
  0xb7   : > { %v463_v37 = vsel %vm1628_vm0, %v462_v36, 2147483647 }
  0xb8   : > { %v464_v38 = vrot.slane %v463_v37, 4 }
  0xba   : > { %vm465_vm5 = vcmp.lt.s32.totalorder %v463_v37, %v464_v38 }
  0xbb   : > { %v466_v39 = vsel %vm465_vm5, %v463_v37, %v464_v38 }
  0xbc   : > { %v467_v40 = vrot.slane %v466_v39, 2 }
  0xbe   : > { %vm468_vm6 = vcmp.lt.s32.totalorder %v466_v39, %v467_v40 }
  0xbf   : > { %v469_v41 = vsel %vm468_vm6, %v466_v39, %v467_v40 }
  0xc0   : > { %v470_v42 = vrot.slane %v469_v41, 1 }
  0xc2   : > { %vm471_vm7 = vcmp.lt.s32.totalorder %v469_v41, %v470_v42 }
  0xc3   : > { %v1402_v43 = vsel %vm471_vm7, %v469_v41, %v470_v42 }
  0xc4   : > { %vm476_vm8 = vcmp.eq.s32.totalorder %v1371_v6, %v1402_v43 }
  0xc5   : > { %v477_v44 = vsel %vm476_vm8, inf, %v452_v24 }
  0xc6   : > { %v478_v45 = vsel %vm1628_vm0, %v477_v44, inf }
  0xc7   : > { %v479_v46 = vrot.slane %v478_v45, 4 }
  0xc9   : > { %v480_v47 = vmin.f32 %v478_v45, %v479_v46 }
  0xcb   : > { %v481_v48 = vrot.slane %v480_v47, 2 }
  0xcd   : > { %v482_v49 = vmin.f32 %v480_v47, %v481_v48 }
  0xcf   : > { %v483_v50 = vrot.slane %v482_v49, 1 }
  0xd1   : > { %v1407_v51 = vmin.f32 %v482_v49, %v483_v50 }
  0xd3   : > { %vm485_vm9 = vcmp.eq.f32.partialorder %v477_v44, %v1407_v51  ;;  %vm1422_vm15 = vcmp.lt.f32.partialorder %v1407_v51, %v474_v1  ;;  %vm498_vm4 = vcmp.lt.f32.partialorder %v1407_v51, inf }
  0xd4   : > { %v486_v52 = vsel %vm485_vm9, %v1371_v6, 1073741824  ;;  %vm1431_vm5 = vmor %vm1422_vm15, %vm498_vm4  ;;  %v502_v8 = vsel %vm498_vm4, %v1407_v51, inf  ;;  %v500_v10 = vsel %vm1422_vm15, %v1407_v51, %v474_v1 }
  0xd5   : > { %v487_v53 = vsel %vm1628_vm0, %v486_v52, 2147483647  ;;  %v1445_v11 = vsel %vm1422_vm15, %v474_v1, %v502_v8  ;;  %v1449_v12 = vsel %vm1431_vm5, inf, %v502_v8 }
  0xd6   : > { %v488_v54 = vrot.slane %v487_v53, 4 }
  0xd8   : > { %vm489_vm10 = vcmp.lt.s32.totalorder %v487_v53, %v488_v54 }
  0xd9   : > { %v490_v55 = vsel %vm489_vm10, %v487_v53, %v488_v54 }
  0xda   : > { %v491_v56 = vrot.slane %v490_v55, 2 }
  0xdc   : > { %vm492_vm11 = vcmp.lt.s32.totalorder %v490_v55, %v491_v56 }
  0xdd   : > { %v493_v57 = vsel %vm492_vm11, %v490_v55, %v491_v56  ;;  %v475_v55 = vsel %vm473_vm14, %v1402_v43, 0  ;;  %vm1639_vm14 = vcmask 64512  }
  0xde   : > { %v494_v58 = vrot.slane %v493_v57, 1 }
  0xe0   : > { %vm495_vm12 = vcmp.lt.s32.totalorder %v493_v57, %v494_v58 }
  0xe1   : > { %v1412_v59 = vsel %vm495_vm12, %v493_v57, %v494_v58 }
  0xe2   : > { %vm508_vm13 = vcmp.eq.s32.totalorder %v1371_v6, %v1412_v59  ;;  %v504_v53 = vsel %vm498_vm4, %v1412_v59, 0  ;;  %v501_v51 = vsel %vm1422_vm15, %v1412_v59, %v475_v55  ;;  %vm1641_vm4 = vmmov %vm1639_vm14 }
  0xe3   : > { %v509_v60 = vsel %vm508_vm13, inf, %v477_v44  ;;  %v505_v56 = vsel %vm1422_vm15, %v475_v55, %v504_v53  ;;  %v507_v58 = vsel %vm1431_vm5, 0, %v504_v53  ;;  %vm1640_vm15 = vmmov 0   ;;  %vm1642_vm5 = vmmov %vm1641_vm4 }
  0xe4   : > { %v510_v61 = vsel %vm1628_vm0, %v509_v60, inf }
  0xe5   : > { %v511_v62 = vrot.slane %v510_v61, 4 }
  0xe7   : > { %v512_v63 = vmin.f32 %v510_v61, %v511_v62 }
  0xe9   : > { %v513_v0 = vrot.slane %v512_v63, 2 }
  0xeb   : > { %v514_v3 = vmin.f32 %v512_v63, %v513_v0 }
  0xed   : > { %v515_v5 = vrot.slane %v514_v3, 1 }
  0xef   : > { %v1438_v9 = vmin.f32 %v514_v3, %v515_v5 }
  0xf1   : > { %vm1452_vm6 = vcmp.lt.f32.partialorder %v1438_v9, %v500_v10  ;;  %vm530_vm7 = vcmp.lt.f32.partialorder %v1438_v9, %v1445_v11  ;;  %vm531_vm8 = vcmp.lt.f32.partialorder %v1438_v9, %v1449_v12  ;;  %vm517_vm10 = vcmp.eq.f32.partialorder %v509_v60, %v1438_v9 }
  0xf2   : > { %vm1465_vm9 = vmor %vm1452_vm6, %vm530_vm7  ;;  %v533_v15 = vsel %vm1452_vm6, %v1438_v9, %v500_v10  ;;  %v535_v16 = vsel %vm530_vm7, %v1438_v9, %v1445_v11  ;;  %v539_v17 = vsel %vm531_vm8, %v1438_v9, %v1449_v12  ;;  %v518_v20 = vsel %vm517_vm10, %v1371_v6, 1073741824  ;;  %v785_v12 = vld [vmem:[%s1622_s6 + $0x10] sm:$0xff] }
  0xf3   : > { %v536_v18 = vsel %vm1452_vm6, %v500_v10, %v535_v16  ;;  %v540_v19 = vsel %vm1465_vm9, %v1445_v11, %v539_v17  ;;  %1156 = vrsqrt.f32 %v533_v15  ;;  %v519_v21 = vsel %vm1628_vm0, %v518_v20, 2147483647  ;;  %v587_v10 = vld [vmem:[%s414_s16] sm:$0xf]  ;;  %799 = vperm.xlu0 %1150, %v785_v12   ;;  %s900_s16 = sshll.u32 %s392_s15, 4  ;;  %s1561_s16 = int_to_ptr.vmem [resolvable:$true] %s900_s16 }
  0xf4   : > { %1158 = vrsqrt.f32 %v536_v18  ;;  %v520_v23 = vrot.slane %v519_v21, 4  ;;  %vm545_vm11 = vcmp.eq.f32.partialorder %v533_v15, inf  ;;  %v548_v26 = vand.u32 2147483648, %v533_v15  ;;  %v783_v11 = vld [vmem:[%s1622_s6] sm:$0xff]  ;;  %s1170_s12 = scalar_lea.vmem %s1561_s16, 256  ;;  %p1177_p1 = scmp.lt.s32.totalorder %s1561_s16, %s1175_s26 }
  0xf5   : > { %1160 = vrsqrt.f32 %v540_v19  ;;  %vm547_vm12 = vcmp.eq.f32.partialorder %v533_v15, 0.0  ;;  %vm555_vm13 = vcmp.eq.f32.partialorder %v536_v18, inf  ;;  %v558_v32 = vand.u32 2147483648, %v536_v18  ;;  %789 = vperm.xlu1 %1149, %v783_v11   ;;  %v819_v16 = vld [vmem:[%s1624_s8] sm:$0xff]  ;;  %p1171_p12 = scmp.ne.s32.totalorder %s1561_s16, %s1170_s12  ;;  %p1178_p2 = scmp.lt.s32.totalorder %s1176_s29, %s1170_s12 }
  0xf6   : > { %vm521_vm1 = vcmp.lt.s32.totalorder %v519_v21, %v520_v23  ;;  %vm557_vm10 = vcmp.eq.f32.partialorder %v536_v18, 0.0  ;;  %vm565_vm3 = vcmp.eq.f32.partialorder %v540_v19, inf  ;;  %v568_v36 = vand.u32 2147483648, %v540_v19 }
  0xf7   : > { %vm567_vm0 = vcmp.eq.f32.partialorder %v540_v19, 0.0  ;;  %v522_v39 = vsel %vm521_vm1, %v519_v21, %v520_v23  ;;  %828 = vperm.xlu0 %1150, %v820_v14   ;;  %v1154_v23 = vld [vmem:[%s1620_s4 + $0x8] sm:$0xff]   ;;  %p1172_p13 = pnand %p1171_p12, %p1348_p4  ;;  %p1179_p3 = por %p1178_p2, %p1177_p1 }
  0xf8   : > { %v523_v44 = vrot.slane %v522_v39, 2 }
  0xf9   : > { %794 = vperm.xlu1 %1149, %v784_v13   ;;  %p1173_p0 = pneg %p1172_p13 }
  0xfb   : > { %p1180_p5 = pnand %p1179_p3, %p1173_p0 }
  0xfd   : > { %v1157_v22 = vpop.eup %1156 }
  0xfe   : > { %v544_v24 = vmul.f32 %v1157_v22, %v533_v15  ;;  %v1159_v25 = vpop.eup %1158 }
  0xff   : > { %v1161_v27 = vpop.eup %1160  ;;  %v554_v30 = vmul.f32 %v1159_v25, %v536_v18 }
 0x100   : > { %v546_v28 = vsel %vm545_vm11, %v533_v15, %v544_v24  ;;  %v564_v33 = vmul.f32 %v1161_v27, %v540_v19  ;;  %vm524_vm11 = vcmp.lt.s32.totalorder %v522_v39, %v523_v44  ;;  %v786_v15 = vld [vmem:[%s1622_s6 + $0x18] sm:$0xff] }
 0x101   : > { %v549_v29 = vsel %vm547_vm12, %v548_v26, %v546_v28  ;;  %v556_v34 = vsel %vm555_vm13, %v536_v18, %v554_v30  ;;  %v525_v46 = vsel %vm524_vm11, %v522_v39, %v523_v44  ;;  %804 = vperm.xlu1 %1149, %v786_v15   ;;  %v1155_v44 = vld [vmem:[%s1623_s7] sm:$0xff]  }
 0x102   : > { %v550_v31 = vadd.f32 1e-08, %v549_v29  ;;  %v559_v37 = vsel %vm557_vm10, %v558_v32, %v556_v34  ;;  %v566_v38 = vsel %vm565_vm3, %v540_v19, %v564_v33  ;;  %v526_v48 = vrot.slane %v525_v46, 1 }
 0x103   : > { %v560_v40 = vadd.f32 1e-08, %v559_v37  ;;  %v569_v41 = vsel %vm567_vm0, %v568_v36, %v566_v38 }
 0x104   : > { %1162 = vrcp.f32 %v550_v31  ;;  %v570_v42 = vadd.f32 1e-08, %v569_v41  ;;  %vm527_vm12 = vcmp.lt.s32.totalorder %v525_v46, %v526_v48 }
 0x105   : > { %1164 = vrcp.f32 %v560_v40  ;;  %v528_v54 = vsel %vm527_vm12, %v525_v46, %v526_v48  ;;  %823 = vperm.xlu1 %1149, %v819_v16  }
 0x106   : > { %1166 = vrcp.f32 %v570_v42  ;;  %v537_v57 = vsel %vm530_vm7, %v528_v54, %v505_v56  ;;  %v541_v60 = vsel %vm531_vm8, %v528_v54, %v507_v58  ;;  %v534_v35 = vsel %vm1452_vm6, %v528_v54, %v501_v51 }
 0x107   : > { %v538_v43 = vsel %vm1452_vm6, %v501_v51, %v537_v57  ;;  %v542_v62 = vsel %vm1465_vm9, %v505_v56, %v541_v60  ;;  %vm579_vm0 = vcmp.eq.s32.totalorder %v1371_v6, %v534_v35  ;;  %vm1643_vm6 = vcmask 130048  }
 0x108   : > { %vm581_vm1 = vcmp.eq.s32.totalorder %v1371_v6, %v538_v43  ;;  %vm584_vm3 = vcmp.eq.s32.totalorder %v1371_v6, %v542_v62  ;;  %v1153_v6 = vld [vmem:[%s1620_s4] sm:$0xff]   ;;  %vm1644_vm7 = vmmov %vm1643_vm6 }
 0x109   : > { %1066 = vmatprep.mubr.msk.bf16.mxu1 %vm1641_vm4, %v1153_v6 }
 0x10e   : > { %v1163_v45 = vpop.eup %1162 }
 0x10f   : > { %v1165_v47 = vpop.eup %1164 }
 0x110   : > { %v573_v49 = vadd.f32 %v1165_v47, %v1163_v45  ;;  %v1167_v50 = vpop.eup %1166 }
 0x112   : > { %v574_v52 = vadd.f32 %v1167_v50, %v573_v49 }
 0x114   : > { %1168 = vrcp.f32 %v574_v52 }
 0x11e   : > { %v1169_v61 = vpop.eup %1168 }
 0x11f   : > { %v576_v63 = vmul.f32 %v1169_v61, %v1163_v45  ;;  %v577_v0 = vmul.f32 %v1169_v61, %v1165_v47  ;;  %v578_v1 = vmul.f32 %v1169_v61, %v1167_v50 }
 0x121   : > { %v580_v59 = vsel %vm579_vm0, %v576_v63, 0.0  ;;  %v582_v2 = vsel %vm581_vm1, %v577_v0, 0.0  ;;  %v585_v5 = vsel %vm584_vm3, %v578_v1, 0.0 }
 0x122   : > { %v583_v3 = vadd.f32 %v582_v2, %v580_v59 }
 0x124   : > { %v586_v7 = vadd.f32 %v585_v5, %v583_v3 }
 0x126   : > { %v588_v8 = vpack.c.bf16 %v586_v7, %v586_v7 }
 0x128   : > { %v595_v9 = vsel %vm593_vm2, %v588_v8, 0 }
 0x129   : > { %1053 = vmatpush3.bf16.msra.mxu0 %v595_v9 }
 0x12a   : > { %1070 = vmatprep.subr.bf16.mxu0 %v1253_v4 }
 0x12c   : > { %1055 = vmatmul.mubr.msk.bf16.vlgmr.msra.gmra.mrb[0].mxu0 %vm1639_vm14, %v587_v10 }
 0x12d   : > { %1074 = vmatprep.mubr.msk.bf16.mxu0 %vm1640_vm15, %v1253_v4 }
 0x172   : > { %v800_v26 = vpop.permute.xlu0 %799 }
 0x174   : > { %v790_v24 = vpop.permute.xlu1 %789 }
 0x176   : > { %v829_v49 = vpop.permute.xlu0 %828 }
 0x178   : > { %v795_v25 = vpop.permute.xlu1 %794 }
 0x180   : > { %v805_v31 = vpop.permute.xlu1 %804 }
 0x184   : > { %v824_v45 = vpop.permute.xlu1 %823 }
 0x1ff   : > { %v631_v17 = vpop.f32.mrb[0].mxu0 }
 0x200   : > { %v641_v18 = vpack.c.bf16 %v631_v17, %v631_v17  ;;  %v1056_v19 = vpop.f32.mrb[1].mxu0 }
 0x201   : > { %v634_v20 = vpop.f32.mrb[2].mxu0 }
 0x202   : > { %v732_v21 = vsel %vm593_vm2, %v641_v18, 0  ;;  %v1057_v22 = vpop.f32.mrb[3].mxu0  ;;  %1083 = vmatprep.subr.msk.bf16.mxu1 %vm593_vm2, %v641_v18  ;;  %vm836_vm2 = vcmask 261120  }
 0x203   : > { %1065 = vmatpush3.bf16.msra.mxu1 %v732_v21 }
 0x206   : > { %1067 = vmatmul.mubr.msk.bf16.vlgmr.msra.gmra.mrb[0].mxu1 %vm1642_vm5, %v1154_v23 }
 0x2d9   : > { %v1068_v27 = vpop.f32.mrb[0].mxu1 }
 0x2da   : > { %v809_v28 = vadd.f32 %v1068_v27, %v800_v26  ;;  %v768_v29 = vpop.f32.mrb[1].mxu1 }
 0x2db   : > { %v807_v30 = vadd.f32 %v790_v24, %v768_v29  ;;  %v1069_v32 = vpop.f32.mrb[2].mxu1 }
 0x2dc   : > { %v810_v33 = vadd.f32 %v1069_v32, %v805_v31  ;;  %v771_v34 = vpop.f32.mrb[3].mxu1  ;;  %v813_v37 = vmax.f32 %v809_v28, 0.0 }
 0x2dd   : > { %v808_v36 = vadd.f32 %v795_v25, %v771_v34  ;;  %v811_v39 = vmax.f32 %v807_v30, 0.0 }
 0x2de   : > { %v814_v38 = vmax.f32 %v810_v33, 0.0 }
 0x2df   : > { %v812_v40 = vmax.f32 %v808_v36, 0.0 }
 0x2e0   : > { %v818_v41 = vpack.c.bf16 %v814_v38, %v813_v37 }
 0x2e1   : > { %v817_v42 = vpack.c.bf16 %v812_v40, %v811_v39 }
 0x2e3   : > { %1071 = vmatpush3.bf16.msra.mxu0 %v817_v42 }
 0x2e4   : > { %1072 = vmatprep.subr.bf16.mxu0 %v1253_v4 }
 0x2e7   : > { %1073 = vmatpush3.bf16.msra.mxu0 %v818_v41 }
 0x2ea   : > { %1075 = vmatmul.mubr.msk.bf16.vlgmr.msra.gmra.mrb[4].mxu0 %vm836_vm2, %v1155_v44 }
 0x3bd   : > { %v874_v46 = vpop.f32.mrb[4].mxu0 }
 0x3be   : > { %v875_v47 = vadd.f32 %v874_v46, %v824_v45  ;;  %v1076_v48 = vpop.f32.mrb[5].mxu0 }
 0x3bf   : > { %v877_v50 = vpop.f32.mrb[6].mxu0 }
 0x3c0   : > { %v881_v4 = vmax.f32 %v875_v47, 0.0  ;;  %v878_v52 = vadd.f32 %v877_v50, %v829_v49  ;;  %v1077_v53 = vpop.f32.mrb[7].mxu0 }
 0x3c2   : > { %883 = vst.msk [vmem:[%s392_s15] sm:$0xff] %vm1643_vm6, %v881_v4  ;;  %v882_v54 = vmax.f32 %v878_v52, 0.0 }
 0x3c4   : > { %884 = vst.msk [vmem:[%s392_s15 + $0x8] sm:$0xff] %vm1644_vm7, %v882_v54 }
 0x3c5   : > { %1183 = shalt.err (!%p1180_p5)
}
 0x3c6   : > { %s1184_s27 = scalar_lea.hbm %s1567_s24, 256  ;;  %s1188_s20 = scalar_lea.hbm %s1625_s9, 512 }
 0x3c7   : > { %p1185_p6 = scmp.ne.s32.totalorder %s1567_s24, %s1184_s27  ;;  %p1189_p10 = scmp.lt.u32.totalorder %s1567_s24, %s1625_s9 }
 0x3c8   : > { %p1190_p11 = scmp.lt.u32.totalorder %s1188_s20, %s1184_s27  ;;  %p1192_p13 = scmp.lt.u32.totalorder %s1184_s27, %s1567_s24 }
 0x3c9   : > { %p1186_p7 = pnand %p1185_p6, %p1348_p4 }
 0x3ca   : > { %p1191_p12 = por %p1190_p11, %p1189_p10 }
 0x3cb   : > { %p1187_p9 = pneg %p1186_p7 }
 0x3cc   : > { %p1193_p0 = por %p1192_p13, %p1191_p12 }
 0x3ce   : > { %p1194_p1 = pnand %p1193_p0, %p1187_p9 }
 0x3d0   : > { %1197 = shalt.err (!%p1194_p1)
}
 0x3d1   : > { %s1256_s12 = smov 128   ;;  %s1257_s26 = smov 8  }
 0x3d2   : > { %1084 = dma.vmem_to_hbm [thread:$0]  (%p1348_p4), %s1561_s16, 256, %s1567_s24, %s1570_s28, %s1256_s12, %s1256_s12, %s1257_s26  }
 0x3d3 PF: > { %p1090_p2 = scmp.ge.s32.totalorder %s1248_s14, 2  ;;  %s915_s29 = sand.u32 1, %s1228_s30  }
 0x3d4   : > { %s916_s27 = scalar_lea.sflag [#allocation3], %s915_s29 }
 0x3d5   : > { %p1087_p3 = pnand %p1090_p2, %p1355_p8 }
 0x3d7   : > { %1223 = dma.done.wait (!%p1087_p3), %s916_s27, 256  }
 0x3d8   : > { %1225 = vsyncadd (!%p1087_p3), %s916_s27, 4294967040  ;;  %s22_s14 = sadd.s32 1, %s1248_s14   ;;  %s1645_s30 = smov %s1232_s10 }
 0x3d9   : > { %p19_p5 = scmp.ge.s32.totalorder %s22_s14, 4   ;;  %s1646_s10 = smov %s1236_s11 }
 0x3da   : > { %s1647_s11 = smov %s1361_s22  ;;  %s1648_s12 = smov %s1244_s13 }
 0x3db   : > { %s1649_s13 = smov %s1651_s17  ;;  %21 = sbr.rel (!%p19_p5) target bundleno = 4 (0x4), region = 100 }
 0x3e2   :  { %921 = vsyncpa [#allocation3], 1 }
 0x3e3   :  { %923 = vsyncpa [#allocation3 + $0x1], 1 }

</bundles_post_ra>
